<compile_context>
chip_gen: v7x
topology: tpu7x:2x2x1
jax: 0.10.0
libtpu: 0.0.40
codegen_flags: <defaults>
</compile_context>

<pallas_src>
import math
from functools import partial

import numpy as np
import jax
import jax.numpy as jnp
from jax.experimental import pallas as pl
from jax.experimental.pallas import tpu as pltpu


# ----------------------------- constants -------------------------------------

_TWO_PI = 2.0 * math.pi
_INV_TWO_PI = 1.0 / _TWO_PI
_PI = math.pi
_PI_2 = math.pi / 2.0
_PI_4 = math.pi / 4.0
_3PI_4 = 3.0 * math.pi / 4.0
_FRIEND_LO = math.radians(16.26 / 2.0)
_FRIEND_HI = math.radians((36.87 + 16.26) / 2.0)
_FRIEND_A = math.radians(16.26)
_FRIEND_B = math.radians(36.87)
_USR_THRESH = math.radians(3.5)
_USR_STEP = math.radians(7.125)


# ----------------------------- Pallas kernel ---------------------------------

def _cordicII_ang_vec(theta):
    """Vectorized (elementwise, VPU/EUP) version of cordicII_ang(theta)."""
    # --- trivial_rotation ---  (floor-mod via multiply by precomputed 1/(2*pi))
    # NOTE: f32 range reduction is accurate for moderate positions m; for very
    # large m the reference (float64) may diverge beyond ~1e-3.
    t = theta - jnp.floor(theta * _INV_TWO_PI) * _TWO_PI
    sgn0 = jnp.where(t > 0, 1.0, -1.0)          # matches Python's '1 if a > 0 else -1'
    t = jnp.where(jnp.abs(t) > _PI, t - sgn0 * _TWO_PI, t)
    abs_t = jnp.abs(t)
    rotmag = jnp.where(abs_t > _3PI_4, _PI, jnp.where(abs_t > _PI_4, _PI_2, 0.0))
    sgn1 = jnp.where(t > 0, 1.0, -1.0)
    r = t - sgn1 * rotmag
    # --- friend_angles ---
    sgn2 = jnp.where(r > 0, 1.0, -1.0)
    abs_r = jnp.abs(r)
    r = jnp.where(abs_r < _FRIEND_LO, r,
                  jnp.where(abs_r < _FRIEND_HI, r - sgn2 * _FRIEND_A, r - sgn2 * _FRIEND_B))
    # --- USRcordic ---
    r = jnp.where(jnp.abs(r) < _USR_THRESH, r,
                  jnp.where(r > 0, r - _USR_STEP, r + _USR_STEP))
    return -(r - theta)


def rope_kernel(m_ref, thetas_ref, veven_ref, out_ref):
    """One batch tile.

    m_ref      : (1, TILE_B)      f32  positions (batch on lanes)
    thetas_ref : (E//2, TILE_B)   f32  base thetas broadcast across lanes (constant tile)
    veven_ref  : (E//2, TILE_B)   f32  v[0::2] transposed (pairs on sublanes)
    out_ref    : (1, TILE_B)      f32  lane-dense per-token scalar results
    """
    rotations = m_ref[...] * thetas_ref[...]                # (H, TILE_B), sublane-bcast of m
    # cordicII rotation estimate; cos_ests == sin_ests in the 'cordicII' branch
    # and ests are identical within each (2k, 2k+1) pair, so compute once per pair.
    ests = 1.57 * jnp.sin(_cordicII_ang_vec(rotations))     # (H, TILE_B)
    # out = cos_ests @ vec + sin_ests @ neg_swapped_vec == 2 * sum_k e_k * v_{2k}
    contrib = ests * veven_ref[...]                         # (H, TILE_B)
    out_ref[...] = 2.0 * jnp.sum(contrib, axis=0, keepdims=True)   # lane-dense (1, TILE_B)


# ------------------------------- wrapper --------------------------------------

@partial(jax.jit, static_argnums=(3,))
def _rope_forward(vecs, ms, thetas, tile_b):
    """vecs: (B, E) f32, ms: (B,) f32, thetas: (E//2,) f32, tile_b static."""
    B, E = vecs.shape
    half = thetas.shape[0]
    n_tiles = -(-B // tile_b)
    b_pad = n_tiles * tile_b
    pad = b_pad - B

    # Layout plumbing (outside the kernel, fused under this jit): take the even
    # feature plane and transpose so the batch sits on the 128-lane axis.
    v_even = jnp.transpose(vecs[:, 0::2])                   # (E//2, B)
    ms_f = ms.astype(jnp.float32)
    if pad:
        v_even = jnp.pad(v_even, ((0, 0), (0, pad)))
        ms_f = jnp.pad(ms_f, (0, pad))                      # padded lanes -> ests=0 -> out=0
    ms2d = ms_f.reshape(1, b_pad)
    thetas_tile = jnp.broadcast_to(thetas.reshape(half, 1), (half, tile_b))

    grid_spec = pltpu.PrefetchScalarGridSpec(
        num_scalar_prefetch=0,
        grid=(n_tiles,),
        in_specs=[
            pl.BlockSpec((1, tile_b), lambda i: (0, i)),      # m (batch on lanes)
            pl.BlockSpec((half, tile_b), lambda i: (0, 0)),   # thetas (constant tile)
            pl.BlockSpec((half, tile_b), lambda i: (0, i)),   # v_even
        ],
        out_specs=pl.BlockSpec((1, tile_b), lambda i: (0, i)),
    )

    out = pl.pallas_call(
        rope_kernel,
        out_shape=jax.ShapeDtypeStruct((1, b_pad), jnp.float32),
        grid_spec=grid_spec,
        compiler_params=pltpu.CompilerParams(
            dimension_semantics=("parallel",),   # batch axis splits across TCs (v7x)
        ),
    )(ms2d, thetas_tile, v_even)

    return out[0, :B]


class RopePallas:
    """JAX/Pallas port of the PyTorch ROPE module (rot='cordicII'), batched."""

    def __init__(self, embedding_len: int, base: int = 10000, max_tile_b: int = 1024):
        assert embedding_len % 2 == 0
        assert max_tile_b % 128 == 0
        self.embedding_len = embedding_len
        self.half = embedding_len // 2
        self.max_tile_b = max_tile_b

        thetas64 = np.array(
            [base ** (-2.0 * i / embedding_len) for i in range(self.half)],
            dtype=np.float64,
        )
        self.thetas_base = thetas64.astype(np.float32)                       # (E//2,)
        self.repeated_thetas = np.repeat(thetas64, 2).astype(np.float32)     # (E,) for ref
        self._thetas_dev = jnp.asarray(self.thetas_base)                     # (E//2,)

    def _batched_call(self, vecs: jax.Array, ms: jax.Array) -> jax.Array:
        vecs = jnp.asarray(vecs, dtype=jnp.float32)      # (B, E)
        ms = jnp.asarray(ms, dtype=jnp.float32)          # (B,)
        B, E = vecs.shape
        assert E == self.embedding_len
        assert ms.shape == (B,)
        # Biggest lane-aligned tile that isn't pure padding for small batches.
        tile_b = min(self.max_tile_b, ((B + 127) // 128) * 128)
        return _rope_forward(vecs, ms, self._thetas_dev, tile_b)

    def __call__(self, vec: jax.Array, m) -> jax.Array:
        vec = jnp.asarray(vec, dtype=jnp.float32)
        if vec.ndim == 1:
            m_arr = jnp.asarray([m], dtype=jnp.float32)
            return self._batched_call(vec[None, :], m_arr)[0]   # 0-d scalar like PyTorch
        return self._batched_call(vec, jnp.asarray(m, dtype=jnp.float32))


# ------------------------- pure-Python reference ------------------------------

def _USRcordic(theta):
    rotdir = 0 if abs(theta) < math.radians(3.5) else 2 * int(theta > 0) - 1
    if rotdir == 0:
        return theta
    elif rotdir == 1:
        return theta - math.radians(7.125)
    else:
        return theta + math.radians(7.125)


def _friend_angles(theta):
    sgn = 1 if theta > 0 else -1
    if abs(theta) < math.radians(16.26 / 2):
        pass
    elif abs(theta) < math.radians((36.87 + 16.26) / 2):
        theta -= sgn * math.radians(16.26)
    else:
        theta -= sgn * math.radians(36.87)
    return theta


def _trivial_rotation(theta):
    theta = theta % (2 * math.pi)
    sgn = lambda a: 1 if a > 0 else -1
    if abs(theta) > math.pi:
        theta += -sgn(theta) * 2 * math.pi
    theta_gt_piby4 = abs(theta) > math.pi / 4
    theta_gt_3piby4 = abs(theta) > 3 * math.pi / 4
    rotmag = math.pi if theta_gt_3piby4 else math.pi / 2 if theta_gt_piby4 else 0
    return theta + -sgn(theta) * rotmag


def _cordicII_ang(theta):
    rtheta = _trivial_rotation(theta)
    rtheta = _friend_angles(rtheta)
    rtheta = _USRcordic(rtheta)
    return -(rtheta - theta)


def rope_reference(vec, m, repeated_thetas):
    v = np.asarray(vec, dtype=np.float64)
    th = np.asarray(repeated_thetas, dtype=np.float64)
    rotations = m * th
    ests = 1.57 * np.sin(np.array([_cordicII_ang(float(t)) for t in rotations]))
    sw = v.reshape(-1, 2)[:, ::-1]
    neg_sw = np.concatenate((-sw[:, 0], sw[:, 1])).reshape(2, -1).T.reshape(-1)
    return float(ests @ v + ests @ neg_sw)


# ----------------------------------- main --------------------------------------

if __name__ == "__main__":
    E = 32     # embedding_len
    B = 8      # batch of token positions

    key = jax.random.PRNGKey(0)
    vecs = jax.random.normal(key, (B, E), dtype=jnp.float32)
    ms = jnp.array([0, 1, 2, 3, 5, 8, 13, 21], dtype=jnp.int32)   # token positions

    rope = RopePallas(E)
    out = jax.block_until_ready(rope(vecs, ms))                    # (B,)

    ref = np.array([
        rope_reference(np.asarray(vecs[b]), int(ms[b]), rope.repeated_thetas)
        for b in range(B)
    ])
    assert np.allclose(np.asarray(out), ref, rtol=2e-3, atol=2e-3), (np.asarray(out), ref)

    # Single-vector path (matches the PyTorch forward signature: vec (E,), m int).
    out1 = jax.block_until_ready(rope(vecs[0], int(ms[0])))
    assert np.allclose(float(out1), ref[0], rtol=2e-3, atol=2e-3), (float(out1), ref[0])

    print("KERNEL_OK")
</pallas_src>

<mosaic_0001>
module attributes {stable_mosaic.version = 11 : i64} {
  func.func @rope_kernel(%arg0: i32, %arg1: memref<1x128xf32, #tpu.memory_space<vmem>>, %arg2: memref<16x128xf32, #tpu.memory_space<vmem>>, %arg3: memref<16x128xf32, #tpu.memory_space<vmem>>, %arg4: memref<1x128xf32, #tpu.memory_space<vmem>>) attributes {dimension_semantics = [#tpu.dimension_semantics<parallel>], iteration_bounds = array<i64: 1>, scalar_prefetch = 0 : i64, scratch_operands = 0 : i64, tpu.core_type = #tpu.core_type<tc>, window_params = [{transform_indices = @transform_0, window_bounds = array<i64: 1, 128>}, {pipeline_mode = #tpu.pipeline_mode<synchronous>, transform_indices = @transform_1, window_bounds = array<i64: 16, 128>}, {transform_indices = @transform_2, window_bounds = array<i64: 16, 128>}, {transform_indices = @transform_3, window_bounds = array<i64: 1, 128>}]} {
    %c0 = arith.constant 0 : index
    %c0_0 = arith.constant 0 : index
    %0 = vector.load %arg1[%c0, %c0_0] : memref<1x128xf32, #tpu.memory_space<vmem>>, vector<1x128xf32>
    %c0_1 = arith.constant 0 : index
    %c0_2 = arith.constant 0 : index
    %1 = vector.load %arg2[%c0_1, %c0_2] : memref<16x128xf32, #tpu.memory_space<vmem>>, vector<16x128xf32>
    %2 = vector.broadcast %0 : vector<1x128xf32> to vector<16x128xf32>
    %3 = arith.mulf %2, %1 : vector<16x128xf32>
    %cst = arith.constant 0.159154937 : f32
    %4 = vector.broadcast %cst : f32 to vector<16x128xf32>
    %5 = arith.mulf %3, %4 : vector<16x128xf32>
    %6 = math.floor %5 : vector<16x128xf32>
    %cst_3 = arith.constant 6.28318548 : f32
    %7 = vector.broadcast %cst_3 : f32 to vector<16x128xf32>
    %8 = arith.mulf %6, %7 : vector<16x128xf32>
    %9 = arith.subf %3, %8 : vector<16x128xf32>
    %cst_4 = arith.constant 0.000000e+00 : f32
    %10 = vector.broadcast %cst_4 : f32 to vector<16x128xf32>
    %11 = arith.cmpf ogt, %9, %10 : vector<16x128xf32>
    %cst_5 = arith.constant 1.000000e+00 : f32
    %cst_6 = arith.constant -1.000000e+00 : f32
    %12 = vector.broadcast %cst_5 : f32 to vector<16x128xf32>
    %13 = vector.broadcast %cst_6 : f32 to vector<16x128xf32>
    %14 = arith.select %11, %12, %13 : vector<16x128xi1>, vector<16x128xf32>
    %15 = math.absf %9 : vector<16x128xf32>
    %cst_7 = arith.constant 3.14159274 : f32
    %16 = vector.broadcast %cst_7 : f32 to vector<16x128xf32>
    %17 = arith.cmpf ogt, %15, %16 : vector<16x128xf32>
    %cst_8 = arith.constant 6.28318548 : f32
    %18 = vector.broadcast %cst_8 : f32 to vector<16x128xf32>
    %19 = arith.mulf %14, %18 : vector<16x128xf32>
    %20 = arith.subf %9, %19 : vector<16x128xf32>
    %21 = arith.select %17, %20, %9 : vector<16x128xi1>, vector<16x128xf32>
    %22 = math.absf %21 : vector<16x128xf32>
    %cst_9 = arith.constant 2.3561945 : f32
    %23 = vector.broadcast %cst_9 : f32 to vector<16x128xf32>
    %24 = arith.cmpf ogt, %22, %23 : vector<16x128xf32>
    %cst_10 = arith.constant 0.785398185 : f32
    %25 = vector.broadcast %cst_10 : f32 to vector<16x128xf32>
    %26 = arith.cmpf ogt, %22, %25 : vector<16x128xf32>
    %cst_11 = arith.constant 1.57079637 : f32
    %cst_12 = arith.constant 0.000000e+00 : f32
    %27 = vector.broadcast %cst_11 : f32 to vector<16x128xf32>
    %28 = vector.broadcast %cst_12 : f32 to vector<16x128xf32>
    %29 = arith.select %26, %27, %28 : vector<16x128xi1>, vector<16x128xf32>
    %cst_13 = arith.constant 3.14159274 : f32
    %30 = vector.broadcast %cst_13 : f32 to vector<16x128xf32>
    %31 = arith.select %24, %30, %29 : vector<16x128xi1>, vector<16x128xf32>
    %cst_14 = arith.constant 0.000000e+00 : f32
    %32 = vector.broadcast %cst_14 : f32 to vector<16x128xf32>
    %33 = arith.cmpf ogt, %21, %32 : vector<16x128xf32>
    %cst_15 = arith.constant 1.000000e+00 : f32
    %cst_16 = arith.constant -1.000000e+00 : f32
    %34 = vector.broadcast %cst_15 : f32 to vector<16x128xf32>
    %35 = vector.broadcast %cst_16 : f32 to vector<16x128xf32>
    %36 = arith.select %33, %34, %35 : vector<16x128xi1>, vector<16x128xf32>
    %37 = arith.mulf %36, %31 : vector<16x128xf32>
    %38 = arith.subf %21, %37 : vector<16x128xf32>
    %cst_17 = arith.constant 0.000000e+00 : f32
    %39 = vector.broadcast %cst_17 : f32 to vector<16x128xf32>
    %40 = arith.cmpf ogt, %38, %39 : vector<16x128xf32>
    %cst_18 = arith.constant 1.000000e+00 : f32
    %cst_19 = arith.constant -1.000000e+00 : f32
    %41 = vector.broadcast %cst_18 : f32 to vector<16x128xf32>
    %42 = vector.broadcast %cst_19 : f32 to vector<16x128xf32>
    %43 = arith.select %40, %41, %42 : vector<16x128xi1>, vector<16x128xf32>
    %44 = math.absf %38 : vector<16x128xf32>
    %cst_20 = arith.constant 0.141895264 : f32
    %45 = vector.broadcast %cst_20 : f32 to vector<16x128xf32>
    %46 = arith.cmpf olt, %44, %45 : vector<16x128xf32>
    %cst_21 = arith.constant 0.46364671 : f32
    %47 = vector.broadcast %cst_21 : f32 to vector<16x128xf32>
    %48 = arith.cmpf olt, %44, %47 : vector<16x128xf32>
    %cst_22 = arith.constant 0.283790529 : f32
    %49 = vector.broadcast %cst_22 : f32 to vector<16x128xf32>
    %50 = arith.mulf %43, %49 : vector<16x128xf32>
    %51 = arith.subf %38, %50 : vector<16x128xf32>
    %cst_23 = arith.constant 0.643502891 : f32
    %52 = vector.broadcast %cst_23 : f32 to vector<16x128xf32>
    %53 = arith.mulf %43, %52 : vector<16x128xf32>
    %54 = arith.subf %38, %53 : vector<16x128xf32>
    %55 = arith.select %48, %51, %54 : vector<16x128xi1>, vector<16x128xf32>
    %56 = arith.select %46, %38, %55 : vector<16x128xi1>, vector<16x128xf32>
    %57 = math.absf %56 : vector<16x128xf32>
    %cst_24 = arith.constant 0.0610865243 : f32
    %58 = vector.broadcast %cst_24 : f32 to vector<16x128xf32>
    %59 = arith.cmpf olt, %57, %58 : vector<16x128xf32>
    %cst_25 = arith.constant 0.000000e+00 : f32
    %60 = vector.broadcast %cst_25 : f32 to vector<16x128xf32>
    %61 = arith.cmpf ogt, %56, %60 : vector<16x128xf32>
    %cst_26 = arith.constant 0.124354713 : f32
    %62 = vector.broadcast %cst_26 : f32 to vector<16x128xf32>
    %63 = arith.subf %56, %62 : vector<16x128xf32>
    %cst_27 = arith.constant 0.124354713 : f32
    %64 = vector.broadcast %cst_27 : f32 to vector<16x128xf32>
    %65 = arith.addf %56, %64 : vector<16x128xf32>
    %66 = arith.select %61, %63, %65 : vector<16x128xi1>, vector<16x128xf32>
    %67 = arith.select %59, %56, %66 : vector<16x128xi1>, vector<16x128xf32>
    %68 = arith.subf %67, %3 : vector<16x128xf32>
    %cst_28 = arith.constant 0.000000e+00 : f32
    %69 = vector.broadcast %cst_28 : f32 to vector<16x128xf32>
    %70 = arith.subf %69, %68 : vector<16x128xf32>
    %71 = math.sin %70 : vector<16x128xf32>
    %cst_29 = arith.constant 1.570000e+00 : f32
    %72 = vector.broadcast %cst_29 : f32 to vector<16x128xf32>
    %73 = arith.mulf %72, %71 : vector<16x128xf32>
    %c0_30 = arith.constant 0 : index
    %c0_31 = arith.constant 0 : index
    %74 = vector.load %arg3[%c0_30, %c0_31] : memref<16x128xf32, #tpu.memory_space<vmem>>, vector<16x128xf32>
    %75 = arith.mulf %73, %74 : vector<16x128xf32>
    %cst_32 = arith.constant dense<0.000000e+00> : vector<128xf32>
    %76 = vector.multi_reduction <add>, %75, %cst_32 [0] : vector<16x128xf32> to vector<128xf32>
    %77 = vector.shape_cast %76 : vector<128xf32> to vector<1x128xf32>
    %cst_33 = arith.constant 2.000000e+00 : f32
    %78 = vector.broadcast %cst_33 : f32 to vector<1x128xf32>
    %79 = arith.mulf %78, %77 : vector<1x128xf32>
    %c0_34 = arith.constant 0 : index
    %c0_35 = arith.constant 0 : index
    %80 = vector.load %arg4[%c0_34, %c0_35] : memref<1x128xf32, #tpu.memory_space<vmem>>, vector<1x128xf32>
    tpu.vector_store %arg4[%c0_34, %c0_35], %79 {strides = array<i32>} : memref<1x128xf32, #tpu.memory_space<vmem>>, vector<1x128xf32>,
    return
  }
  func.func @transform_0(%arg0: i32) -> (i32, i32) {
    %c0_i32 = arith.constant 0 : i32
    %c0_i32_0 = arith.constant 0 : i32
    return %c0_i32, %arg0 : i32, i32
  }
  func.func @transform_1(%arg0: i32) -> (i32, i32) {
    %c0_i32 = arith.constant 0 : i32
    %c0_i32_0 = arith.constant 0 : i32
    %c0_i32_1 = arith.constant 0 : i32
    return %c0_i32, %c0_i32_0 : i32, i32
  }
  func.func @transform_2(%arg0: i32) -> (i32, i32) {
    %c0_i32 = arith.constant 0 : i32
    %c0_i32_0 = arith.constant 0 : i32
    return %c0_i32, %arg0 : i32, i32
  }
  func.func @transform_3(%arg0: i32) -> (i32, i32) {
    %c0_i32 = arith.constant 0 : i32
    %c0_i32_0 = arith.constant 0 : i32
    return %c0_i32, %arg0 : i32, i32
  }
}

</mosaic_0001>

<bundles_post_ra>
// kernel: _rope_forward.1
= control target key start
LH: loop header
LB: loop body
LE: loop exit
PB: predicated region body
PF: predicated region fallthrough
CT: control target
= control target key end

     0   :  { %v367_v15 = vmov -1.0   ;;  %v368_v28 = vmov 0.0   ;;  %s493_s0 = inlined_call_operand.vmem [shape: f32[1,128], index: 0, kind: input, shape index: {}]   ;;  %s494_s1 = inlined_call_operand.vmem [shape: f32[16,128], index: 1, kind: input, shape index: {}]   ;;  %s495_s2 = inlined_call_operand.vmem [shape: f32[16,128], index: 2, kind: input, shape index: {}]   ;;  %s496_s3 = inlined_call_operand.vmem [shape: f32[1,128], index: 3, kind: output, shape index: {}]  }
   0x1   :  { %v332_v0 = vld [vmem:[%s493_s0] ss:$0 sm:$0xff]  ;;  %v16_v2 = vld [vmem:[%s494_s1 + $0x8] sm:$0xff] }
   0x2   :  { %v15_v1 = vld [vmem:[%s494_s1] sm:$0xff]  ;;  %v406_v4 = vmul.f32 %v332_v0, %v16_v2 }
   0x3   :  { %v404_v3 = vmul.f32 %v332_v0, %v15_v1 }
   0x4   :  { %v26_v6 = vmul.f32 0.15915494, %v406_v4 }
   0x5   :  { %v25_v5 = vmul.f32 0.15915494, %v404_v3 }
   0x6   :  { %v28_v8 = vfloor.f32 %v26_v6 }
   0x7   :  { %v27_v7 = vfloor.f32 %v25_v5 }
   0x8   :  { %v30_v10 = vmul.f32 6.2831855, %v28_v8 }
   0x9   :  { %v29_v9 = vmul.f32 6.2831855, %v27_v7 }
   0xa   :  { %v32_v12 = vsub.f32 %v406_v4, %v30_v10 }
   0xb   :  { %v31_v11 = vsub.f32 %v404_v3, %v29_v9 }
   0xc   :  { %vm34_vm1 = vcmp.gt.f32.partialorder %v32_v12, 0.0  ;;  %v38_v14 = vand.u32 2147483647, %v32_v12 }
   0xd   :  { %vm33_vm0 = vcmp.gt.f32.partialorder %v31_v11, 0.0  ;;  %v37_v13 = vand.u32 2147483647, %v31_v11  ;;  %v36_v17 = vsel %vm34_vm1, 1.0, %v367_v15 }
   0xe   :  { %v35_v16 = vsel %vm33_vm0, 1.0, %v367_v15  ;;  %v42_v19 = vmul.f32 6.2831855, %v36_v17  ;;  %vm40_vm3 = vcmp.gt.f32.partialorder %v38_v14, 3.1415927 }
   0xf   :  { %v41_v18 = vmul.f32 6.2831855, %v35_v16  ;;  %vm39_vm2 = vcmp.gt.f32.partialorder %v37_v13, 3.1415927 }
  0x10   :  { %v44_v21 = vsub.f32 %v32_v12, %v42_v19 }
  0x11   :  { %v43_v20 = vsub.f32 %v31_v11, %v41_v18 }
  0x12   :  { %v46_v23 = vsel %vm40_vm3, %v44_v21, %v32_v12 }
  0x13   :  { %v45_v22 = vsel %vm39_vm2, %v43_v20, %v31_v11  ;;  %v48_v25 = vand.u32 2147483647, %v46_v23  ;;  %vm58_vm5 = vcmp.gt.f32.partialorder %v46_v23, 0.0 }
  0x14   :  { %v47_v24 = vand.u32 2147483647, %v45_v22  ;;  %vm57_vm4 = vcmp.gt.f32.partialorder %v45_v22, 0.0  ;;  %v60_v27 = vsel %vm58_vm5, 1.0, %v367_v15 }
  0x15   :  { %v59_v26 = vsel %vm57_vm4, 1.0, %v367_v15  ;;  %vm50_vm8 = vcmp.gt.f32.partialorder %v48_v25, 2.3561945  ;;  %vm52_vm9 = vcmp.gt.f32.partialorder %v48_v25, 0.7853982 }
  0x16   :  { %vm49_vm6 = vcmp.gt.f32.partialorder %v47_v24, 2.3561945  ;;  %vm51_vm7 = vcmp.gt.f32.partialorder %v47_v24, 0.7853982  ;;  %v54_v30 = vsel %vm52_vm9, 1.5707964, %v368_v28 }
  0x17   :  { %v53_v29 = vsel %vm51_vm7, 1.5707964, %v368_v28  ;;  %v56_v32 = vsel %vm50_vm8, 3.1415927, %v54_v30  ;;  %v369_v25 = vmov 683565275  }
  0x18   :  { %v55_v31 = vsel %vm49_vm6, 3.1415927, %v53_v29  ;;  %v62_v34 = vmul.f32 %v60_v27, %v56_v32  ;;  %v370_v27 = vmov 2475754826   ;;  %v371_v29 = vmov 2131351028  }
  0x19   :  { %v61_v33 = vmul.f32 %v59_v26, %v55_v31  ;;  %v372_v31 = vmov 2102212464  }
  0x1a   :  { %v64_v36 = vsub.f32 %v46_v23, %v62_v34 }
  0x1b   :  { %v63_v35 = vsub.f32 %v45_v22, %v61_v33  ;;  %v373_v33 = vmov 920167782  }
  0x1c   :  { %vm66_vm11 = vcmp.gt.f32.partialorder %v64_v36, 0.0  ;;  %v70_v39 = vand.u32 2147483647, %v64_v36 }
  0x1d   :  { %vm65_vm10 = vcmp.gt.f32.partialorder %v63_v35, 0.0  ;;  %v69_v38 = vand.u32 2147483647, %v63_v35  ;;  %v68_v40 = vsel %vm66_vm11, 1.0, %v367_v15 }
  0x1e   :  { %v67_v37 = vsel %vm65_vm10, 1.0, %v367_v15  ;;  %v76_v42 = vmul.f32 0.28379053, %v68_v40  ;;  %v80_v44 = vmul.f32 0.6435029, %v68_v40 }
  0x1f   :  { %v75_v41 = vmul.f32 0.28379053, %v67_v37  ;;  %v79_v43 = vmul.f32 0.6435029, %v67_v37  ;;  %vm71_vm12 = vcmp.lt.f32.partialorder %v69_v38, 0.14189526 }
  0x20   :  { %vm73_vm13 = vcmp.lt.f32.partialorder %v69_v38, 0.4636467  ;;  %vm74_vm14 = vcmp.lt.f32.partialorder %v70_v39, 0.4636467  ;;  %vm72_vm15 = vcmp.lt.f32.partialorder %v70_v39, 0.14189526  ;;  %v78_v46 = vsub.f32 %v64_v36, %v76_v42 }
  0x21   :  { %v77_v45 = vsub.f32 %v63_v35, %v75_v41  ;;  %v81_v47 = vsub.f32 %v63_v35, %v79_v43  ;;  %v82_v48 = vsub.f32 %v64_v36, %v80_v44  ;;  %v374_v41 = vmov 1326507024  }
  0x23   :  { %v83_v49 = vsel %vm73_vm13, %v77_v45, %v81_v47  ;;  %v84_v50 = vsel %vm74_vm14, %v78_v46, %v82_v48 }
  0x24   :  { %v85_v51 = vsel %vm71_vm12, %v63_v35, %v83_v49  ;;  %v86_v52 = vsel %vm72_vm15, %v64_v36, %v84_v50 }
  0x25   :  { %v87_v53 = vand.u32 2147483647, %v85_v51  ;;  %v88_v54 = vand.u32 2147483647, %v86_v52  ;;  %vm91_vm0 = vcmp.gt.f32.partialorder %v85_v51, 0.0  ;;  %vm92_vm1 = vcmp.gt.f32.partialorder %v86_v52, 0.0 }
  0x26   :  { %v333_v55 = vadd.f32 -0.12435471, %v85_v51  ;;  %v334_v56 = vadd.f32 -0.12435471, %v86_v52  ;;  %v95_v57 = vadd.f32 0.12435471, %v85_v51 }
  0x27   :  { %vm89_vm2 = vcmp.lt.f32.partialorder %v87_v53, 0.061086524  ;;  %vm90_vm3 = vcmp.lt.f32.partialorder %v88_v54, 0.061086524  ;;  %v96_v58 = vadd.f32 0.12435471, %v86_v52 }
  0x28   :  { %v97_v59 = vsel %vm91_vm0, %v333_v55, %v95_v57 }
  0x29   :  { %v98_v60 = vsel %vm92_vm1, %v334_v56, %v96_v58  ;;  %v99_v61 = vsel %vm89_vm2, %v85_v51, %v97_v59 }
  0x2a   :  { %v100_v62 = vsel %vm90_vm3, %v86_v52, %v98_v60  ;;  %v101_v63 = vsub.f32 %v99_v61, %v404_v3 }
  0x2b   :  { %v102_v0 = vsub.f32 %v100_v62, %v406_v4 }
  0x2c   :  { %v414_v1 = vsub.f32 0.0, %v101_v63 }
  0x2d   :  { %v416_v2 = vsub.f32 0.0, %v102_v0 }
  0x2e   :  { %v105_v5 = vand.u32 2147483647, %v414_v1  ;;  %v108_v6 = vand.u32 2139095040, %v414_v1  ;;  %vm107_vm2 = vcmp.lt.s32.totalorder %v414_v1, 0 }
  0x2f   :  { %v209_v7 = vand.u32 2147483647, %v416_v2  ;;  %v212_v8 = vand.u32 2139095040, %v416_v2 }
  0x30   :  { %v109_v9 = vshrl.u32 %v108_v6, 23  ;;  %v112_v10 = vand.u32 8388607, %v105_v5  ;;  %vm106_vm3 = vcmp.le.f32.partialorder %v105_v5, 0.7853982 }
  0x31   :  { %v213_v11 = vshrl.u32 %v212_v8, 23  ;;  %v216_v3 = vand.u32 8388607, %v209_v7 }
  0x32   :  { %v335_v4 = vadd.s32 4294967169, %v109_v9  ;;  %v113_v14 = vor.u32 8388608, %v112_v10 }
  0x33   :  { %v339_v12 = vadd.s32 4294967169, %v213_v11  ;;  %v217_v15 = vor.u32 8388608, %v216_v3 }
  0x34   :  { %v115_v13 = vadd.s32 1, %v335_v4  ;;  %v426_v21 = vshll.u32 %v113_v14, 8 }
  0x35   :  { %v219_v16 = vadd.s32 1, %v339_v12  ;;  %v428_v23 = vshll.u32 %v217_v15, 8 }
  0x36   :  { %vm116_vm4 = vcmp.gt.s32.totalorder %v115_v13, 0 }
  0x37   :  { %v117_v17 = vsel %vm116_vm4, %v115_v13, 0  ;;  %vm220_vm5 = vcmp.gt.s32.totalorder %v219_v16, 0  ;;  %vm211_vm4 = vcmp.lt.s32.totalorder %v416_v2, 0 }
  0x38   :  { %v118_v18 = vshrl.u32 %v117_v17, 5  ;;  %v119_v19 = vand.u32 31, %v117_v17  ;;  %v221_v20 = vsel %vm220_vm5, %v219_v16, 0  ;;  %vm210_vm5 = vcmp.le.f32.partialorder %v209_v7, 0.7853982 }
  0x39   :  { %v223_v22 = vand.u32 31, %v221_v20  ;;  %v430_v35 = vshrl.u32 %v221_v20, 5 }
  0x3a   :  { %v120_v24 = vsub.s32 32, %v119_v19  ;;  %v122_v26 = vshll.u32 %v369_v25, %v119_v19  ;;  %v125_v28 = vshll.u32 %v370_v27, %v119_v19  ;;  %v128_v30 = vshll.u32 %v371_v29, %v119_v19 }
  0x3b   :  { %v131_v32 = vshll.u32 %v372_v31, %v119_v19  ;;  %v134_v34 = vshll.u32 %v373_v33, %v119_v19  ;;  %vm137_vm6 = vcmp.lt.s32.totalorder %v118_v18, 1  ;;  %vm138_vm7 = vcmp.lt.s32.totalorder %v118_v18, 2 }
  0x3c   :  { %v121_v36 = vshrl.u32 %v369_v25, %v120_v24  ;;  %v123_v37 = vshrl.u32 %v370_v27, %v120_v24  ;;  %v126_v38 = vshrl.u32 %v371_v29, %v120_v24  ;;  %v129_v39 = vshrl.u32 %v372_v31, %v120_v24 }
  0x3d   :  { %v132_v40 = vshrl.u32 %v373_v33, %v120_v24  ;;  %v135_v42 = vshrl.u32 %v374_v41, %v120_v24  ;;  %vm140_vm8 = vcmp.lt.s32.totalorder %v118_v18, 4  ;;  %v224_v46 = vsub.s32 32, %v223_v22 }
  0x3e   :  { %v124_v43 = vor.u32 %v123_v37, %v122_v26  ;;  %v127_v44 = vor.u32 %v126_v38, %v125_v28  ;;  %v130_v45 = vor.u32 %v129_v39, %v128_v30  ;;  %vm139_vm9 = vcmp.lt.s32.totalorder %v118_v18, 3 }
  0x3f   :  { %v133_v47 = vor.u32 %v132_v40, %v131_v32  ;;  %v136_v48 = vor.u32 %v135_v42, %v134_v34  ;;  %v226_v49 = vshll.u32 %v369_v25, %v223_v22  ;;  %v229_v57 = vshll.u32 %v370_v27, %v223_v22 }
  0x40   :  { %v141_v50 = vsel %vm137_vm6, %v121_v36, %v124_v43  ;;  %v142_v51 = vsel %vm140_vm8, %v130_v45, 2102212464  ;;  %v145_v52 = vsel %vm137_vm6, %v124_v43, %v127_v44  ;;  %v149_v53 = vsel %vm137_vm6, %v127_v44, %v130_v45 }
  0x41   :  { %v143_v54 = vsel %vm139_vm9, %v127_v44, %v142_v51  ;;  %v146_v55 = vsel %vm140_vm8, %v133_v47, 920167782  ;;  %v150_v56 = vsel %vm140_vm8, %v136_v48, 1326507024  ;;  %v225_v60 = vshrl.u32 %v369_v25, %v224_v46 }
  0x42   :  { %v147_v58 = vsel %vm139_vm9, %v130_v45, %v146_v55  ;;  %v151_v59 = vsel %vm139_vm9, %v133_v47, %v150_v56  ;;  %v227_v61 = vshrl.u32 %v370_v27, %v224_v46  ;;  %v144_v62 = vsel %vm138_vm7, %v141_v50, %v143_v54 }
  0x43   :  { %v148_v63 = vsel %vm138_vm7, %v145_v52, %v147_v58  ;;  %v152_v0 = vsel %vm138_vm7, %v149_v53, %v151_v59  ;;  %v230_v6 = vshrl.u32 %v371_v29, %v224_v46  ;;  %v232_v12 = vshll.u32 %v371_v29, %v223_v22 }
  0x44   :  { %v439_v8 = vmul.u32.u64.low %v426_v21, %v152_v0  ;;  %v440_v9 = vmul.u32.u64.high %v426_v21, %v152_v0, %v439_v8  ;;  %v443_v10 = vmul.u32.u64.low %v426_v21, %v148_v63  ;;  %v444_v11 = vmul.u32.u64.high %v426_v21, %v148_v63, %v443_v10 }
  0x45   :  { %v228_v3 = vor.u32 %v227_v61, %v226_v49  ;;  %v231_v4 = vor.u32 %v230_v6, %v229_v57  ;;  %v233_v13 = vshrl.u32 %v372_v31, %v224_v46  ;;  %v235_v14 = vshll.u32 %v372_v31, %v223_v22 }
  0x46   :  { %v236_v15 = vshrl.u32 %v373_v33, %v224_v46  ;;  %v238_v16 = vshll.u32 %v373_v33, %v223_v22  ;;  %v239_v17 = vshrl.u32 %v374_v41, %v224_v46  ;;  %v160_v18 = vmul.u32 %v426_v21, %v144_v62 }
  0x47   :  { %v234_v19 = vor.u32 %v233_v13, %v232_v12  ;;  %vm241_vm10 = vcmp.lt.s32.totalorder %v430_v35, 1  ;;  %vm242_vm11 = vcmp.lt.s32.totalorder %v430_v35, 2  ;;  %vm162_vm12 = vc.u32 %v440_v9, %v443_v10 }
  0x48   :  { %v163_v20 = vadd.s32 1, %v444_v11  ;;  %v237_v24 = vor.u32 %v236_v15, %v235_v14  ;;  %vm243_vm13 = vcmp.lt.s32.totalorder %v430_v35, 3  ;;  %v240_v25 = vor.u32 %v239_v17, %v238_v16 }
  0x49   :  { %vm244_vm14 = vcmp.lt.s32.totalorder %v430_v35, 4  ;;  %v245_v26 = vsel %vm241_vm10, %v225_v60, %v228_v3  ;;  %v249_v22 = vsel %vm241_vm10, %v228_v3, %v231_v4  ;;  %v253_v29 = vsel %vm241_vm10, %v231_v4, %v234_v19 }
  0x4a   :  { %v164_v27 = vsel %vm162_vm12, %v163_v20, %v444_v11  ;;  %v246_v21 = vsel %vm244_vm14, %v234_v19, 2102212464  ;;  %v250_v28 = vsel %vm244_vm14, %v237_v24, 920167782  ;;  %v254_v33 = vsel %vm244_vm14, %v240_v25, 1326507024 }
  0x4b   :  { %v165_v30 = vadd.s32 %v164_v27, %v160_v18  ;;  %v247_v31 = vsel %vm243_vm13, %v231_v4, %v246_v21  ;;  %v251_v32 = vsel %vm243_vm13, %v234_v19, %v250_v28  ;;  %v255_v37 = vsel %vm243_vm13, %v237_v24, %v254_v33 }
  0x4c   :  { %v248_v34 = vsel %vm242_vm11, %v245_v26, %v247_v31  ;;  %v252_v36 = vsel %vm242_vm11, %v249_v22, %v251_v32  ;;  %v256_v39 = vsel %vm242_vm11, %v253_v29, %v255_v37  ;;  %v161_v58 = vadd.s32 %v443_v10, %v440_v9 }
  0x4d   :  { %v166_v38 = vadd.s32 536870912, %v165_v30  ;;  %v461_v40 = vmul.u32.u64.low %v428_v23, %v252_v36  ;;  %v462_v41 = vmul.u32.u64.high %v428_v23, %v252_v36, %v461_v40  ;;  %v264_v45 = vmul.u32 %v428_v23, %v248_v34 }
  0x4e   :  { %v465_v42 = vmul.u32.u64.low %v428_v23, %v256_v39  ;;  %v466_v43 = vmul.u32.u64.high %v428_v23, %v256_v39, %v465_v42  ;;  %vm197_vm9 = vweird.f32 %v414_v1  ;;  %vm301_vm13 = vweird.f32 %v416_v2 }
  0x4f   :  { %v167_v44 = vshrl.u32 %v166_v38, 30  ;;  %v267_v47 = vadd.s32 1, %v462_v41 }
  0x50   :  { %vm266_vm15 = vc.u32 %v466_v43, %v461_v40  ;;  %v265_v14 = vadd.s32 %v461_v40, %v466_v43 }
  0x51   :  { %v168_v46 = vshll.u32 %v167_v44, 30  ;;  %v268_v35 = vsel %vm266_vm15, %v267_v47, %v462_v41  ;;  %v191_v9 = vsub.s32 4, %v167_v44 }
  0x52   :  { %v269_v49 = vadd.s32 %v268_v35, %v264_v45 }
  0x53   :  { %v169_v48 = vsub.s32 %v165_v30, %v168_v46  ;;  %v192_v26 = vsel %vm107_vm2, %v191_v9, %v167_v44 }
  0x54   :  { %v270_v51 = vadd.s32 536870912, %v269_v49  ;;  %v194_v29 = vsel %vm106_vm3, 0, %v192_v26 }
  0x55   :  { %v171_v50 = vsub.s32 0, %v169_v48  ;;  %v198_v34 = vadd.s32 3, %v194_v29 }
  0x56   :  { %v271_v53 = vshrl.u32 %v270_v51, 30 }
  0x57   :  { %v336_v52 = vmin.u32 %v171_v50, %v169_v48  ;;  %v199_v38 = vand.u32 3, %v198_v34 }
  0x58   :  { %v272_v55 = vshll.u32 %v271_v53, 30  ;;  %v295_v33 = vsub.s32 4, %v271_v53 }
  0x59   :  { %v173_v54 = vclz %v336_v52  ;;  %vm204_vm6 = vcmp.eq.s32.totalorder %v199_v38, 2  ;;  %vm201_vm7 = vcmp.eq.s32.totalorder %v199_v38, 0  ;;  %vm200_vm8 = vcmp.lt.s32.totalorder %v199_v38, 2 }
  0x5a   :  { %v273_v57 = vsub.s32 %v269_v49, %v272_v55  ;;  %v296_v37 = vsel %vm211_vm4, %v295_v33, %v271_v53 }
  0x5b   :  { %v337_v56 = vadd.s32 4294967294, %v173_v54  ;;  %v298_v41 = vsel %vm210_vm5, 0, %v296_v37 }
  0x5c   :  { %v275_v59 = vsub.s32 0, %v273_v57  ;;  %v302_v45 = vadd.s32 3, %v298_v41 }
  0x5d   :  { %vm338_vm0 = vcmp.lt.s32.totalorder %v337_v56, 0 }
  0x5e   :  { %v176_v23 = vsel %vm338_vm0, 0, %v337_v56  ;;  %v340_v63 = vmin.u32 %v275_v59, %v273_v57  ;;  %v303_v7 = vand.u32 3, %v302_v45 }
  0x5f   :  { %v177_v60 = vsub.s32 32, %v176_v23  ;;  %v178_v61 = vshll.u32 %v169_v48, %v176_v23  ;;  %v181_v62 = vsub.s32 4294967266, %v176_v23  ;;  %v316_v23 = vld [vmem:[%s495_s2 + $0x8] sm:$0xff] }
  0x60   :  { %v277_v8 = vclz %v340_v63  ;;  %vm308_vm10 = vcmp.eq.s32.totalorder %v303_v7, 2  ;;  %vm305_vm11 = vcmp.eq.s32.totalorder %v303_v7, 0  ;;  %vm304_vm12 = vcmp.lt.s32.totalorder %v303_v7, 2 }
  0x61   :  { %v179_v0 = vshrl.u32 %v161_v58, %v177_v60  ;;  %v182_v6 = vadd.s32 127, %v181_v62 }
  0x62   :  { %v341_v4 = vadd.s32 4294967294, %v277_v8 }
  0x63   :  { %v180_v11 = vor.u32 %v179_v0, %v178_v61  ;;  %v183_v3 = vshll.u32 %v182_v6, 23 }
  0x64   :  { %vm342_vm1 = vcmp.lt.s32.totalorder %v341_v4, 0 }
  0x65   :  { %v184_v12 = vor.u32 4788187, %v183_v3  ;;  %v187_v13 = vcvt.s32.f32 %v180_v11  ;;  %v280_v10 = vsel %vm342_vm1, 0, %v341_v4 }
  0x66   :  { %v281_v16 = vsub.s32 32, %v280_v10  ;;  %v282_v17 = vshll.u32 %v273_v57, %v280_v10  ;;  %v285_v18 = vsub.s32 4294967266, %v280_v10  ;;  %v315_v57 = vld [vmem:[%s495_s2] sm:$0xff] }
  0x67   :  { %v185_v15 = vand.u32 2147483647, %v184_v12 }
  0x68   :  { %v283_v20 = vshrl.u32 %v265_v14, %v281_v16  ;;  %v286_v24 = vadd.s32 127, %v285_v18 }
  0x69   :  { %v188_v19 = vmul.f32 %v187_v13, %v185_v15 }
  0x6a   :  { %v284_v22 = vor.u32 %v283_v20, %v282_v17  ;;  %v287_v27 = vshll.u32 %v286_v24, 23 }
  0x6b   :  { %v189_v25 = vxor.u32 2147483648, %v188_v19 }
  0x6c   :  { %v288_v30 = vor.u32 4788187, %v287_v27  ;;  %v291_v31 = vcvt.s32.f32 %v284_v22 }
  0x6d   :  { %v190_v21 = vsel %vm107_vm2, %v189_v25, %v188_v19 }
  0x6e   :  { %v193_v28 = vsel %vm106_vm3, %v414_v1, %v190_v21  ;;  %v289_v32 = vand.u32 2147483647, %v288_v30 }
  0x6f   :  { %359 = vcosq.f32 %v193_v28 }
  0x70   :  { %361 = vsinq.f32 %v193_v28  ;;  %v292_v36 = vmul.f32 %v291_v31, %v289_v32 }
  0x72   :  { %v293_v5 = vxor.u32 2147483648, %v292_v36 }
  0x74   :  { %v294_v39 = vsel %vm211_vm4, %v293_v5, %v292_v36 }
  0x75   :  { %v297_v40 = vsel %vm210_vm5, %v416_v2, %v294_v39 }
  0x76   :  { %363 = vcosq.f32 %v297_v40 }
  0x77   :  { %365 = vsinq.f32 %v297_v40 }
  0x79   :  { %v360_v42 = vpop.eup %359 }
  0x7a   :  { %v362_v43 = vpop.eup %361  ;;  %v205_v44 = vxor.u32 2147483648, %v360_v42 }
  0x7b   :  { %v202_v46 = vxor.u32 2147483648, %v362_v43 }
  0x7c   :  { %v206_v47 = vsel %vm204_vm6, %v205_v44, %v362_v43 }
  0x7d   :  { %v203_v48 = vsel %vm201_vm7, %v360_v42, %v202_v46 }
  0x7e   :  { %v207_v35 = vsel %vm200_vm8, %v203_v48, %v206_v47 }
  0x7f   :  { %v208_v50 = vsel %vm197_vm9, nan, %v207_v35 }
  0x80   :  { %v364_v49 = vpop.eup %363  ;;  %v313_v55 = vmul.f32 1.57, %v208_v50 }
  0x81   :  { %v366_v51 = vpop.eup %365  ;;  %v309_v52 = vxor.u32 2147483648, %v364_v49 }
  0x82   :  { %v306_v53 = vxor.u32 2147483648, %v366_v51  ;;  %v317_v60 = vmul.f32 %v315_v57, %v313_v55 }
  0x83   :  { %v310_v54 = vsel %vm308_vm10, %v309_v52, %v366_v51 }
  0x84   :  { %v307_v56 = vsel %vm305_vm11, %v364_v49, %v306_v53 }
  0x85   :  { %v311_v58 = vsel %vm304_vm12, %v307_v56, %v310_v54 }
  0x86   :  { %v312_v1 = vsel %vm301_vm13, nan, %v311_v58 }
  0x87   :  { %v314_v59 = vmul.f32 1.57, %v312_v1 }
  0x89   :  { %v318_v61 = vmul.f32 %v316_v23, %v314_v59 }
  0x8b   :  { %v319_v62 = vadd.f32 %v318_v61, %v317_v60 }
  0x8d   :  { %v320_v63 = vrot.slane %v319_v62, 4 }
  0x8f   :  { %v321_v0 = vadd.f32 %v320_v63, %v319_v62 }
  0x91   :  { %v322_v2 = vrot.slane %v321_v0, 2 }
  0x93   :  { %v323_v6 = vadd.f32 %v322_v2, %v321_v0 }
  0x95   :  { %v324_v8 = vrot.slane %v323_v6, 1 }
  0x97   :  { %v325_v11 = vadd.f32 %v324_v8, %v323_v6 }
  0x99   :  { %v326_v3 = vmul.f32 2.0, %v325_v11 }
  0x9b   :  { %327 = vst [vmem:[%s496_s3] sm:$0x1] %v326_v3 }

</bundles_post_ra>
